<compile_context>
chip_gen: v6e
topology: v6e:2x2x1
jax: 0.10.0
libtpu: 0.0.40
codegen_flags: <defaults>
</compile_context>

<pallas_src>
import jax
import jax.numpy as jnp
from jax.experimental import pallas as pl
from jax.experimental.pallas import tpu as pltpu

LANE = 128  # TPU lane width; the output feature dim is padded to this.


def _round_up(n, m):
    return ((n + m - 1) // m) * m


def mlp_kernel(x_ref, w1_ref, b1_ref, w2_ref, b2_ref, w3_ref, b3_ref, o_ref):
    # x arrives as f32 straight from HBM; cast to bf16 in VMEM (no extra HBM
    # pass).  Matmuls run on the MXU in bf16; accumulation, biases, relu and
    # softmax stay in f32.
    x = x_ref[...].astype(w1_ref.dtype)

    h1 = jnp.dot(x, w1_ref[...], preferred_element_type=jnp.float32) + b1_ref[...]
    h1 = jnp.maximum(h1, 0.0)

    h2 = (jnp.dot(h1.astype(w2_ref.dtype), w2_ref[...],
                  preferred_element_type=jnp.float32) + b2_ref[...])
    h2 = jnp.maximum(h2, 0.0)

    logits = (jnp.dot(h2.astype(w3_ref.dtype), w3_ref[...],
                      preferred_element_type=jnp.float32) + b3_ref[...])

    # Numerically stable softmax over the (padded, lane-dense) last axis.
    # Padded columns carry bias -1e30 -> exp(...) == 0, so they don't leak
    # into the denominator.
    m = jnp.max(logits, axis=-1, keepdims=True)
    e = jnp.exp(logits - m)
    denom = jnp.sum(e, axis=-1, keepdims=True)
    o_ref[...] = (e * pl.reciprocal(denom, approx=False)).astype(o_ref.dtype)


def prepare_params(params, matmul_dtype=jnp.bfloat16):
    """One-time weight prep (pad output dim to 128 lanes, cast to bf16).

    Call once and reuse the result across forward calls — avoids per-call
    pad/cast XLA ops and HBM round-trips."""
    w1, b1, w2, b2, w3, b3 = params
    F_out = w3.shape[1]
    F_out_p = _round_up(F_out, LANE)

    w1_p = w1.astype(matmul_dtype)                       # (F_in, 128), K unpadded
    w2_p = w2.astype(matmul_dtype)                       # (128, 128)
    w3_p = jnp.pad(w3, ((0, 0), (0, F_out_p - F_out))).astype(matmul_dtype)
    b1_p = b1.astype(jnp.float32)
    b2_p = b2.astype(jnp.float32)
    # Padded logits columns get a huge negative bias -> softmax prob 0.
    b3_p = jnp.pad(b3.astype(jnp.float32), ((0, 0), (0, F_out_p - F_out)),
                   constant_values=-1e30)
    return (w1_p, b1_p, w2_p, b2_p, w3_p, b3_p, F_out)


def mlp_forward(seq, prepared, *, batch_tile=1024, out_dtype=jnp.bfloat16):
    """seq: (B, board, board) float32 -> (B, board*board) softmax probs."""
    w1_p, b1_p, w2_p, b2_p, w3_p, b3_p, F_out = prepared
    B = seq.shape[0]
    F_in, H = w1_p.shape
    F_out_p = w3_p.shape[1]

    x = seq.reshape(B, -1).astype(jnp.float32)           # (B, F_in), stays f32
    assert x.shape[1] == F_in

    # ---- batch tile selection -------------------------------------------
    # Multiple of 16 (bf16 sublane packing); shrink for tiny batches so B=2
    # isn't padded to 1024.  For batches >= 512 rows force >= 2 grid steps so
    # the "parallel" axis can shard across both TensorCores on v7x.
    Bp16 = _round_up(B, 16)
    tile = min(batch_tile, Bp16)
    if Bp16 >= 512:
        tile = min(tile, _round_up(pl.cdiv(Bp16, 2), 16))
    tile = _round_up(tile, 16)
    Bp = _round_up(B, tile)

    # Only the batch dim is padded (no feature-dim pad, no host-side cast).
    x_p = jnp.pad(x, ((0, Bp - B), (0, 0)))

    grid = (Bp // tile,)

    w_itemsize = jnp.dtype(w1_p.dtype).itemsize
    flops = 2 * Bp * (F_in * H + H * H + H * F_out_p)
    bytes_accessed = (
        Bp * F_in * 4                                               # x read (f32)
        + (F_in * H + H * H + H * F_out_p) * w_itemsize             # weights
        + (H + H + F_out_p) * 4                                     # biases
        + Bp * F_out_p * jnp.dtype(out_dtype).itemsize              # output write
    )
    cost = pl.CostEstimate(flops=flops,
                           transcendentals=Bp * F_out_p,
                           bytes_accessed=bytes_accessed)

    out = pl.pallas_call(
        mlp_kernel,
        out_shape=jax.ShapeDtypeStruct((Bp, F_out_p), out_dtype),
        grid_spec=pltpu.PrefetchScalarGridSpec(
            num_scalar_prefetch=0,
            grid=grid,
            in_specs=[
                pl.BlockSpec((tile, F_in), lambda i: (i, 0)),     # x tile (f32)
                pl.BlockSpec((F_in, H), lambda i: (0, 0)),        # W1
                pl.BlockSpec((1, H), lambda i: (0, 0)),           # b1
                pl.BlockSpec((H, H), lambda i: (0, 0)),           # W2
                pl.BlockSpec((1, H), lambda i: (0, 0)),           # b2
                pl.BlockSpec((H, F_out_p), lambda i: (0, 0)),     # W3 (padded)
                pl.BlockSpec((1, F_out_p), lambda i: (0, 0)),     # b3 (padded)
            ],
            out_specs=pl.BlockSpec((tile, F_out_p), lambda i: (i, 0)),
        ),
        compiler_params=pltpu.CompilerParams(
            dimension_semantics=("parallel",),
            vmem_limit_bytes=32 * 1024 * 1024,
        ),
        cost_estimate=cost,
    )(x_p, w1_p, b1_p, w2_p, b2_p, w3_p, b3_p)

    # Strip batch padding and the padded softmax lanes (their probs are 0).
    return out[:B, :F_out]


def init_params(key, board_size=8, hidden=128):
    """Init mimicking torch.nn.Linear (U[-1/sqrt(fan_in), 1/sqrt(fan_in)]).

    Weights are stored as (in_features, out_features)."""
    f = board_size * board_size
    k1, k2, k3, k4, k5, k6 = jax.random.split(key, 6)

    def lin(kw, kb, fan_in, fan_out):
        bound = 1.0 / jnp.sqrt(fan_in)
        w = jax.random.uniform(kw, (fan_in, fan_out), jnp.float32, -bound, bound)
        b = jax.random.uniform(kb, (1, fan_out), jnp.float32, -bound, bound)
        return w, b

    w1, b1 = lin(k1, k2, f, hidden)
    w2, b2 = lin(k3, k4, hidden, hidden)
    w3, b3 = lin(k5, k6, hidden, f)
    return (w1, b1, w2, b2, w3, b3)


def mlp_reference(seq, params):
    """Pure-JAX f32 reference for correctness checking."""
    w1, b1, w2, b2, w3, b3 = params
    x = seq.reshape(seq.shape[0], -1).astype(jnp.float32)
    h1 = jnp.maximum(x @ w1 + b1, 0.0)
    h2 = jnp.maximum(h1 @ w2 + b2, 0.0)
    logits = h2 @ w3 + b3
    return jax.nn.softmax(logits, axis=-1)


if __name__ == "__main__":
    board_size = 8       # Othello board -> 64 input / output features
    batch = 2

    key = jax.random.PRNGKey(0)
    kp, kx = jax.random.split(key)

    params = init_params(kp, board_size=board_size, hidden=128)
    prepared = prepare_params(params)   # one-time weight prep (cache in prod)
    seq = jax.random.normal(kx, (batch, board_size, board_size), jnp.float32)

    fwd = jax.jit(lambda s: mlp_forward(s, prepared))
    out = jax.block_until_ready(fwd(seq))

    ref = mlp_reference(seq, params)
    out_f32 = out.astype(jnp.float32)
    assert out.shape == (batch, board_size * board_size)
    # bf16 matmul operands + bf16 output -> relaxed tolerances vs f32 ref.
    assert jnp.allclose(out_f32, ref, atol=5e-3, rtol=5e-2)
    assert jnp.allclose(jnp.sum(out_f32, axis=-1), 1.0, atol=5e-3)

    print("KERNEL_OK")
</pallas_src>

<mosaic_0001>
module attributes {stable_mosaic.version = 11 : i64} {
  func.func @mlp_kernel(%arg0: i32, %arg1: memref<16x64xf32, #tpu.memory_space<vmem>>, %arg2: memref<64x128xbf16, #tpu.memory_space<vmem>>, %arg3: memref<1x128xf32, #tpu.memory_space<vmem>>, %arg4: memref<128x128xbf16, #tpu.memory_space<vmem>>, %arg5: memref<1x128xf32, #tpu.memory_space<vmem>>, %arg6: memref<128x128xbf16, #tpu.memory_space<vmem>>, %arg7: memref<1x128xf32, #tpu.memory_space<vmem>>, %arg8: memref<16x128xbf16, #tpu.memory_space<vmem>>) attributes {dimension_semantics = [#tpu.dimension_semantics<parallel>], iteration_bounds = array<i64: 1>, scalar_prefetch = 0 : i64, scratch_operands = 0 : i64, tpu.core_type = #tpu.core_type<tc>, window_params = [{transform_indices = @transform_0, window_bounds = array<i64: 16, 64>}, {pipeline_mode = #tpu.pipeline_mode<synchronous>, transform_indices = @transform_1, window_bounds = array<i64: 64, 128>}, {pipeline_mode = #tpu.pipeline_mode<synchronous>, transform_indices = @transform_2, window_bounds = array<i64: 1, 128>}, {pipeline_mode = #tpu.pipeline_mode<synchronous>, transform_indices = @transform_3, window_bounds = array<i64: 128, 128>}, {pipeline_mode = #tpu.pipeline_mode<synchronous>, transform_indices = @transform_4, window_bounds = array<i64: 1, 128>}, {pipeline_mode = #tpu.pipeline_mode<synchronous>, transform_indices = @transform_5, window_bounds = array<i64: 128, 128>}, {pipeline_mode = #tpu.pipeline_mode<synchronous>, transform_indices = @transform_6, window_bounds = array<i64: 1, 128>}, {transform_indices = @transform_7, window_bounds = array<i64: 16, 128>}]} {
    %c0 = arith.constant 0 : index
    %c0_0 = arith.constant 0 : index
    %0 = vector.load %arg1[%c0, %c0_0] : memref<16x64xf32, #tpu.memory_space<vmem>>, vector<16x64xf32>
    %1 = arith.truncf %0 : vector<16x64xf32> to vector<16x64xbf16>
    %c0_1 = arith.constant 0 : index
    %c0_2 = arith.constant 0 : index
    %2 = vector.load %arg2[%c0_1, %c0_2] : memref<64x128xbf16, #tpu.memory_space<vmem>>, vector<64x128xbf16>
    %cst = arith.constant dense<0.000000e+00> : vector<16x128xf32>
    %3 = tpu.matmul %1, %2, %cst {dimension_numbers = #tpu.dot_dimension_numbers<[1], [0], [0], [1], [0, 0, 1, 1], [], []>} : vector<16x64xbf16>, vector<64x128xbf16>, vector<16x128xf32> -> vector<16x128xf32>
    %c0_3 = arith.constant 0 : index
    %c0_4 = arith.constant 0 : index
    %4 = vector.load %arg3[%c0_3, %c0_4] : memref<1x128xf32, #tpu.memory_space<vmem>>, vector<1x128xf32>
    %5 = vector.broadcast %4 : vector<1x128xf32> to vector<16x128xf32>
    %6 = arith.addf %3, %5 : vector<16x128xf32>
    %cst_5 = arith.constant 0.000000e+00 : f32
    %7 = vector.broadcast %cst_5 : f32 to vector<16x128xf32>
    %8 = arith.maximumf %6, %7 : vector<16x128xf32>
    %9 = arith.truncf %8 : vector<16x128xf32> to vector<16x128xbf16>
    %c0_6 = arith.constant 0 : index
    %c0_7 = arith.constant 0 : index
    %10 = vector.load %arg4[%c0_6, %c0_7] : memref<128x128xbf16, #tpu.memory_space<vmem>>, vector<128x128xbf16>
    %cst_8 = arith.constant dense<0.000000e+00> : vector<16x128xf32>
    %11 = tpu.matmul %9, %10, %cst_8 {dimension_numbers = #tpu.dot_dimension_numbers<[1], [0], [0], [1], [0, 0, 1, 1], [], []>} : vector<16x128xbf16>, vector<128x128xbf16>, vector<16x128xf32> -> vector<16x128xf32>
    %c0_9 = arith.constant 0 : index
    %c0_10 = arith.constant 0 : index
    %12 = vector.load %arg5[%c0_9, %c0_10] : memref<1x128xf32, #tpu.memory_space<vmem>>, vector<1x128xf32>
    %13 = vector.broadcast %12 : vector<1x128xf32> to vector<16x128xf32>
    %14 = arith.addf %11, %13 : vector<16x128xf32>
    %cst_11 = arith.constant 0.000000e+00 : f32
    %15 = vector.broadcast %cst_11 : f32 to vector<16x128xf32>
    %16 = arith.maximumf %14, %15 : vector<16x128xf32>
    %17 = arith.truncf %16 : vector<16x128xf32> to vector<16x128xbf16>
    %c0_12 = arith.constant 0 : index
    %c0_13 = arith.constant 0 : index
    %18 = vector.load %arg6[%c0_12, %c0_13] : memref<128x128xbf16, #tpu.memory_space<vmem>>, vector<128x128xbf16>
    %cst_14 = arith.constant dense<0.000000e+00> : vector<16x128xf32>
    %19 = tpu.matmul %17, %18, %cst_14 {dimension_numbers = #tpu.dot_dimension_numbers<[1], [0], [0], [1], [0, 0, 1, 1], [], []>} : vector<16x128xbf16>, vector<128x128xbf16>, vector<16x128xf32> -> vector<16x128xf32>
    %c0_15 = arith.constant 0 : index
    %c0_16 = arith.constant 0 : index
    %20 = vector.load %arg7[%c0_15, %c0_16] : memref<1x128xf32, #tpu.memory_space<vmem>>, vector<1x128xf32>
    %21 = vector.broadcast %20 : vector<1x128xf32> to vector<16x128xf32>
    %22 = arith.addf %19, %21 : vector<16x128xf32>
    %cst_17 = arith.constant dense<0xFF800000> : vector<16xf32>
    %23 = vector.multi_reduction <maximumf>, %22, %cst_17 [1] : vector<16x128xf32> to vector<16xf32>
    %24 = vector.shape_cast %23 : vector<16xf32> to vector<16x1xf32>
    %25 = vector.broadcast %24 : vector<16x1xf32> to vector<16x128xf32>
    %26 = arith.subf %22, %25 : vector<16x128xf32>
    %27 = math.exp %26 : vector<16x128xf32>
    %cst_18 = arith.constant dense<0.000000e+00> : vector<16xf32>
    %28 = vector.multi_reduction <add>, %27, %cst_18 [1] : vector<16x128xf32> to vector<16xf32>
    %29 = vector.shape_cast %28 : vector<16xf32> to vector<16x1xf32>
    %30 = tpu.reciprocal %29 : vector<16x1xf32> -> vector<16x1xf32>
    %31 = vector.broadcast %30 : vector<16x1xf32> to vector<16x128xf32>
    %32 = arith.mulf %27, %31 : vector<16x128xf32>
    %33 = arith.truncf %32 : vector<16x128xf32> to vector<16x128xbf16>
    %c0_19 = arith.constant 0 : index
    %c0_20 = arith.constant 0 : index
    %34 = vector.load %arg8[%c0_19, %c0_20] : memref<16x128xbf16, #tpu.memory_space<vmem>>, vector<16x128xbf16>
    tpu.vector_store %arg8[%c0_19, %c0_20], %33 {strides = array<i32>} : memref<16x128xbf16, #tpu.memory_space<vmem>>, vector<16x128xbf16>,
    return
  }
  func.func @transform_0(%arg0: i32) -> (i32, i32) {
    %c0_i32 = arith.constant 0 : i32
    %c0_i32_0 = arith.constant 0 : i32
    return %arg0, %c0_i32 : i32, i32
  }
  func.func @transform_1(%arg0: i32) -> (i32, i32) {
    %c0_i32 = arith.constant 0 : i32
    %c0_i32_0 = arith.constant 0 : i32
    %c0_i32_1 = arith.constant 0 : i32
    return %c0_i32, %c0_i32_0 : i32, i32
  }
  func.func @transform_2(%arg0: i32) -> (i32, i32) {
    %c0_i32 = arith.constant 0 : i32
    %c0_i32_0 = arith.constant 0 : i32
    %c0_i32_1 = arith.constant 0 : i32
    return %c0_i32, %c0_i32_0 : i32, i32
  }
  func.func @transform_3(%arg0: i32) -> (i32, i32) {
    %c0_i32 = arith.constant 0 : i32
    %c0_i32_0 = arith.constant 0 : i32
    %c0_i32_1 = arith.constant 0 : i32
    return %c0_i32, %c0_i32_0 : i32, i32
  }
  func.func @transform_4(%arg0: i32) -> (i32, i32) {
    %c0_i32 = arith.constant 0 : i32
    %c0_i32_0 = arith.constant 0 : i32
    %c0_i32_1 = arith.constant 0 : i32
    return %c0_i32, %c0_i32_0 : i32, i32
  }
  func.func @transform_5(%arg0: i32) -> (i32, i32) {
    %c0_i32 = arith.constant 0 : i32
    %c0_i32_0 = arith.constant 0 : i32
    %c0_i32_1 = arith.constant 0 : i32
    return %c0_i32, %c0_i32_0 : i32, i32
  }
  func.func @transform_6(%arg0: i32) -> (i32, i32) {
    %c0_i32 = arith.constant 0 : i32
    %c0_i32_0 = arith.constant 0 : i32
    %c0_i32_1 = arith.constant 0 : i32
    return %c0_i32, %c0_i32_0 : i32, i32
  }
  func.func @transform_7(%arg0: i32) -> (i32, i32) {
    %c0_i32 = arith.constant 0 : i32
    %c0_i32_0 = arith.constant 0 : i32
    return %arg0, %c0_i32 : i32, i32
  }
}

</mosaic_0001>

<bundles_post_ra>
// kernel: _lambda_.1
= control target key start
LH: loop header
LB: loop body
LE: loop exit
PB: predicated region body
PF: predicated region fallthrough
CT: control target
= control target key end

     0   :  { %12 = vsyncpa [#allocation3], 0  ;;  %s700_s0 = inlined_call_operand.vmem [shape: f32[16,64], index: 0, kind: input, shape index: {}]   ;;  %s701_s1 = inlined_call_operand.vmem [shape: bf16[64,128], index: 1, kind: input, shape index: {}]   ;;  %s702_s2 = inlined_call_operand.vmem [shape: f32[1,128], index: 2, kind: input, shape index: {}]   ;;  %s703_s3 = inlined_call_operand.hbm [shape: bf16[128,128], index: 3, kind: input, shape index: {}]   ;;  %s704_s4 = inlined_call_operand.vmem [shape: f32[1,128], index: 4, kind: input, shape index: {}]   ;;  %s705_s5 = inlined_call_operand.hbm [shape: bf16[128,128], index: 5, kind: input, shape index: {}]   ;;  %s706_s6 = inlined_call_operand.vmem [shape: f32[1,128], index: 6, kind: input, shape index: {}]   ;;  %s707_s7 = inlined_call_operand.vmem [shape: bf16[16,128], index: 7, kind: output, shape index: {}]  }
   0x1   :  { %13 = vsyncpa [#allocation5], 0  ;;  %s592_s24 = smov [#allocation2]  }
   0x2   :  { %s25_s25 = sshll.u32 %s592_s24, 4  ;;  %s26_s25 = int_to_ptr.vmem [resolvable:$true] %s25_s25 }
   0x3   :  { %s556_s26 = scalar_lea.vmem %s26_s25, 1024  ;;  %p561_p1 = scmp.lt.s32.totalorder %s26_s25, %s26_s25 }
   0x4   :  { %p557_p0 = scmp.ne.s32.totalorder %s26_s25, %s556_s26  ;;  %p562_p2 = scmp.lt.s32.totalorder %s556_s26, %s556_s26 }
   0x6   :  { %p563_p3 = por %p562_p2, %p561_p1 }
   0x8   :  { %p564_p4 = pnand %p563_p3, %p557_p0 }
   0xa   :  { %567 = shalt.err (!%p564_p4)
}
   0xb   :  { %s593_s27 = smov 64   ;;  %s594_s28 = smov 4  }
   0xc   :  { %31 = dma.hbm_to_vmem [thread:$0]  %s703_s3, 1024, %s26_s25, [#allocation3], %s593_s27, %s593_s27, %s594_s28  }
   0xd   :  { %s595_s8 = smov [#allocation4]  }
   0xe   :  { %s39_s9 = sshll.u32 %s595_s8, 4  ;;  %s40_s9 = int_to_ptr.vmem [resolvable:$true] %s39_s9 }
   0xf   :  { %s576_s10 = scalar_lea.vmem %s40_s9, 1024  ;;  %p581_p6 = scmp.lt.s32.totalorder %s40_s9, %s40_s9 }
  0x10   :  { %p577_p5 = scmp.ne.s32.totalorder %s40_s9, %s576_s10  ;;  %p582_p7 = scmp.lt.s32.totalorder %s576_s10, %s576_s10 }
  0x12   :  { %p583_p8 = por %p582_p7, %p581_p6 }
  0x14   :  { %p584_p9 = pnand %p583_p8, %p577_p5 }
  0x16   :  { %587 = shalt.err (!%p584_p9)
}
  0x17   :  { %45 = dma.hbm_to_vmem [thread:$0]  %s705_s5, 1024, %s40_s9, [#allocation5], %s593_s27, %s593_s27, %s594_s28  }
  0x18   :  { %588 = dma.done.wait [#allocation3], 1024  }
  0x19   :  { %589 = vsyncadd [#allocation3], 4294966272 }
  0x1a   :  { %590 = dma.done.wait [#allocation5], 1024  }
  0x1b   :  { %591 = vsyncadd [#allocation5], 4294966272  ;;  %v596_v0 = vmov 0.0   ;;  %vm597_vm0 = vmmov 0   ;;  %v520_v1 = vld [vmem:[%s701_s1 + $0x18] sm:$0xff]   ;;  %v521_v2 = vld [vmem:[%s701_s1 + $0x10] sm:$0xff]  }
  0x1c   :  { %462 = vmatprep.subr.bf16.mxu0 %v596_v0  ;;  %470 = vmatprep.mubr.msk.bf16.mxu0 %vm597_vm0, %v596_v0  ;;  %v524_v3 = vld [vmem:[#allocation2 + $0x38] sm:$0xff]   ;;  %v522_v4 = vld [vmem:[%s701_s1 + $0x8] sm:$0xff]   ;;  %v525_v5 = vld [vmem:[#allocation2 + $0x30] sm:$0xff]   ;;  %vm97_vm1 = vcmask 523264  }
  0x1d   :  { %474 = vmatprep.subr.bf16.mxu1 %v596_v0  ;;  %490 = vmatprep.mubr.msk.bf16.mxu1 %vm597_vm0, %v596_v0  ;;  %v523_v6 = vld [vmem:[%s701_s1] sm:$0xff]   ;;  %v56_v8 = vld [vmem:[%s700_s0 + $0x8] sm:$0xff]  ;;  %v528_v12 = vld [vmem:[#allocation2 + $0x18] sm:$0xff]  }
  0x1e   :  { %463 = vmatpush3.bf16.msra.mxu0 %v520_v1  ;;  %475 = vmatpush3.bf16.msra.mxu1 %v524_v3  ;;  %v55_v7 = vld [vmem:[%s700_s0] sm:$0xff]  ;;  %v526_v9 = vld [vmem:[#allocation2 + $0x28] sm:$0xff]   ;;  %v529_v13 = vld [vmem:[#allocation2 + $0x10] sm:$0xff]  }
  0x1f   :  { %464 = vmatprep.subr.bf16.mxu0 %v596_v0  ;;  %476 = vmatprep.subr.bf16.mxu1 %v596_v0  ;;  %v57_v10 = vpack.c.bf16 %v56_v8, %v55_v7  ;;  %v527_v11 = vld [vmem:[#allocation2 + $0x20] sm:$0xff]   ;;  %v530_v14 = vld [vmem:[#allocation2 + $0x8] sm:$0xff]   ;;  %v532_v16 = vld [vmem:[#allocation4 + $0x38] sm:$0xff]  }
  0x20   :  { %v531_v15 = vld [vmem:[#allocation2] sm:$0xff]   ;;  %v533_v17 = vld [vmem:[#allocation4 + $0x30] sm:$0xff]   ;;  %v534_v18 = vld [vmem:[#allocation4 + $0x28] sm:$0xff]  }
  0x21   :  { %v535_v19 = vld [vmem:[#allocation4 + $0x20] sm:$0xff]   ;;  %v536_v20 = vld [vmem:[#allocation4 + $0x18] sm:$0xff]   ;;  %v537_v31 = vld [vmem:[#allocation4 + $0x10] sm:$0xff]  }
  0x22   :  { %465 = vmatpush3.bf16.msra.mxu0 %v521_v2  ;;  %477 = vmatpush3.bf16.msra.mxu1 %v525_v5  ;;  %v406_v21 = vld [vmem:[%s702_s2] ss:$0 sm:$0xff]  ;;  %v538_v32 = vld [vmem:[#allocation4 + $0x8] sm:$0xff]  }
  0x23   :  { %466 = vmatprep.subr.bf16.mxu0 %v596_v0  ;;  %478 = vmatprep.subr.bf16.mxu1 %v596_v0  ;;  %v539_v33 = vld [vmem:[#allocation4] sm:$0xff]  }
  0x24   :  { %v412_v34 = vld [vmem:[%s704_s4] ss:$0 sm:$0xff] }
  0x25   :  { %v421_v44 = vld [vmem:[%s706_s6] ss:$0 sm:$0xff] }
  0x26   :  { %467 = vmatpush3.bf16.msra.mxu0 %v522_v4  ;;  %479 = vmatpush3.bf16.msra.mxu1 %v526_v9 }
  0x27   :  { %468 = vmatprep.subr.bf16.mxu0 %v596_v0  ;;  %480 = vmatprep.subr.bf16.mxu1 %v596_v0 }
  0x2a   :  { %469 = vmatpush3.bf16.msra.mxu0 %v523_v6  ;;  %481 = vmatpush3.bf16.msra.mxu1 %v527_v11 }
  0x2b   :  { %494 = vmatprep.subr.bf16.mxu0 %v596_v0  ;;  %482 = vmatprep.subr.bf16.mxu1 %v596_v0 }
  0x2d   :  { %471 = vmatmul.mubr.msk.bf16.vlgmr.msra.gmra.mxu0 %vm97_vm1, %v57_v10 }
  0x2e   :  { %510 = vmatprep.mubr.msk.bf16.mxu0 %vm597_vm0, %v596_v0  ;;  %483 = vmatpush3.bf16.msra.mxu1 %v528_v12 }
  0x2f   :  { %484 = vmatprep.subr.bf16.mxu1 %v596_v0  ;;  %495 = vmatpush3.bf16.msra.mxu0 %v532_v16 }
  0x30   :  { %496 = vmatprep.subr.bf16.mxu0 %v596_v0 }
  0x32   :  { %485 = vmatpush3.bf16.msra.mxu1 %v529_v13 }
  0x33   :  { %486 = vmatprep.subr.bf16.mxu1 %v596_v0  ;;  %497 = vmatpush3.bf16.msra.mxu0 %v533_v17 }
  0x34   :  { %498 = vmatprep.subr.bf16.mxu0 %v596_v0 }
  0x36   :  { %487 = vmatpush3.bf16.msra.mxu1 %v530_v14 }
  0x37   :  { %488 = vmatprep.subr.bf16.mxu1 %v596_v0  ;;  %499 = vmatpush3.bf16.msra.mxu0 %v534_v18 }
  0x38   :  { %500 = vmatprep.subr.bf16.mxu0 %v596_v0 }
  0x3a   :  { %489 = vmatpush3.bf16.msra.mxu1 %v531_v15 }
  0x3b   :  { %501 = vmatpush3.bf16.msra.mxu0 %v535_v19 }
  0x3c   :  { %502 = vmatprep.subr.bf16.mxu0 %v596_v0 }
  0x3f   :  { %503 = vmatpush3.bf16.msra.mxu0 %v536_v20 }
  0x40   :  { %504 = vmatprep.subr.bf16.mxu0 %v596_v0 }
  0x43   :  { %505 = vmatpush3.bf16.msra.mxu0 %v537_v31 }
  0x44   :  { %506 = vmatprep.subr.bf16.mxu0 %v596_v0 }
  0x47   :  { %507 = vmatpush3.bf16.msra.mxu0 %v538_v32 }
  0x48   :  { %508 = vmatprep.subr.bf16.mxu0 %v596_v0 }
  0x4b   :  { %509 = vmatpush3.bf16.msra.mxu0 %v539_v33 }
  0xed   :  { %v135_v22 = vpop.f32.mrf.mxu0 }
  0xee   :  { %v136_v24 = vadd.f32 %v406_v21, %v135_v22 }
  0xef   :  { %v472_v23 = vpop.f32.mrf.mxu0 }
  0xf0   :  { %v142_v28 = vmax.f32 %v136_v24, 0.0 }
  0xf1   :  { %v138_v25 = vpop.f32.mrf.mxu0 }
  0xf2   :  { %v139_v26 = vadd.f32 %v406_v21, %v138_v25 }
  0xf3   :  { %v473_v27 = vpop.f32.mrf.mxu0 }
  0xf4   :  { %v143_v29 = vmax.f32 %v139_v26, 0.0 }
  0xf6   :  { %v144_v30 = vpack.c.bf16 %v143_v29, %v142_v28 }
  0xf8   :  { %491 = vmatmul.mubr.bf16.vlgmr.msra.gmra.mxu1 %v144_v30 }
 0x1b8   :  { %v250_v35 = vpop.f32.mrf.mxu1 }
 0x1b9   :  { %v251_v37 = vadd.f32 %v412_v34, %v250_v35 }
 0x1ba   :  { %v492_v36 = vpop.f32.mrf.mxu1 }
 0x1bb   :  { %v257_v41 = vmax.f32 %v251_v37, 0.0 }
 0x1bc   :  { %v253_v38 = vpop.f32.mrf.mxu1 }
 0x1bd   :  { %v254_v39 = vadd.f32 %v412_v34, %v253_v38 }
 0x1be   :  { %v493_v40 = vpop.f32.mrf.mxu1 }
 0x1bf   :  { %v258_v42 = vmax.f32 %v254_v39, 0.0 }
 0x1c1   :  { %v259_v43 = vpack.c.bf16 %v258_v42, %v257_v41 }
 0x1c3   :  { %511 = vmatmul.mubr.bf16.vlgmr.msra.gmra.mxu0 %v259_v43 }
 0x283   :  { %v365_v45 = vpop.f32.mrf.mxu0 }
 0x284   :  { %v366_v46 = vadd.f32 %v421_v44, %v365_v45 }
 0x285   :  { %v512_v47 = vpop.f32.mrf.mxu0 }
 0x286   :  { %372 = vmax.xlane.f32.xlu0 %v366_v46 }
 0x287   :  { %v368_v48 = vpop.f32.mrf.mxu0 }
 0x288   :  { %v369_v49 = vadd.f32 %v421_v44, %v368_v48 }
 0x289   :  { %v513_v50 = vpop.f32.mrf.mxu0 }
 0x28a   :  { %374 = vmax.xlane.f32.xlu0 %v369_v49 }
 0x30f   :  { %v373_v51 = vpop.xlane.xlu0 %372 }
 0x310   :  { %v376_v52 = vsub.f32 %v366_v46, %v373_v51 }
 0x312   :  { %v378_v53 = vmul.f32 1.442695, %v376_v52 }
 0x313   :  { %v375_v54 = vpop.xlane.xlu0 %374 }
 0x314   :  { %540 = vpow2.f32 %v378_v53  ;;  %v377_v55 = vsub.f32 %v369_v49, %v375_v54 }
 0x316   :  { %v380_v56 = vmul.f32 1.442695, %v377_v55 }
 0x318   :  { %542 = vpow2.f32 %v380_v56 }
 0x321   :  { %v541_v57 = vpop.eup %540 }
 0x322   :  { %382 = vadd.xlane.f32.xlu1 %v541_v57 }
 0x325   :  { %v543_v58 = vpop.eup %542 }
 0x326   :  { %384 = vadd.xlane.f32.xlu1 %v543_v58 }
 0x3ab   :  { %v383_v59 = vpop.xlane.xlu1 %382 }
 0x3ac   :  { %544 = vrcp.f32 %v383_v59 }
 0x3af   :  { %v385_v60 = vpop.xlane.xlu1 %384 }
 0x3b0   :  { %546 = vrcp.f32 %v385_v60 }
 0x3b9   :  { %v545_v61 = vpop.eup %544 }
 0x3ba   :  { %v388_v63 = vmul.f32 %v545_v61, %v541_v57 }
 0x3bd   :  { %v547_v62 = vpop.eup %546 }
 0x3be   :  { %v389_v0 = vmul.f32 %v547_v62, %v543_v58 }
 0x3c0   :  { %v437_v1 = vpack.c.bf16 %v389_v0, %v388_v63 }
 0x3c2   :  { %438 = vst [vmem:[%s707_s7] sm:$0xff] %v437_v1  }
 0x3c3   :  { %404 = vsyncpa [#allocation3], 1 }
 0x3c4   :  { %405 = vsyncpa [#allocation5], 1 }

</bundles_post_ra>
